<compile_context>
chip_gen: v6e
topology: v6e:2x2x1
jax: 0.10.0
libtpu: 0.0.40
codegen_flags: <defaults>
</compile_context>

<pallas_src>
import functools

import jax
import jax.numpy as jnp
import numpy as np
from jax import lax
from jax.experimental import pallas as pl
from jax.experimental.pallas import tpu as pltpu

_BN_EPS = 1e-5


def _round_up(x, m):
    return (x + m - 1) // m * m


# ---------------------------------------------------------------------------
# Fused  (optional ReLU) -> depthwise 3x3 -> pointwise 1x1 -> BatchNorm
# ---------------------------------------------------------------------------
def _sepconv_bn_kernel(x_ref, w_ref, b_ref, o_ref, *, k, d, Wp, L, apply_relu):
    """One image per grid step; spatial-on-lanes layout.

    x_ref : (1, C_in, L_in)     flattened, spatially padded input
    w_ref : (k*k, C_out, C_in)  per-tap folded (depthwise * pointwise * bn_scale)
    b_ref : (C_out, 1)          folded BN bias
    o_ref : (1, C_out, L)       flattened output (garbage cols removed by wrapper)
    """
    acc = jnp.zeros(o_ref.shape[1:], jnp.float32)
    for kh in range(k):
        for kw in range(k):
            off = kh * d * Wp + kw * d                  # static lane offset
            xt = x_ref[0, :, pl.ds(off, L)]             # (C_in, L) ref-view load
            if apply_relu:
                xt = jnp.maximum(xt, 0.0)
            acc = acc + jnp.dot(w_ref[kh * k + kw], xt,
                                preferred_element_type=jnp.float32)
    o_ref[0] = (acc + b_ref[...]).astype(o_ref.dtype)


def separable_conv_bn(x_nchw, w_dw, w_pw, bn_scale, bn_bias, *,
                      kernel_size=3, padding=1, dilation=1, apply_relu=True):
    """y = BN(pointwise(depthwise(maybe_relu(x)))), stride 1, NCHW in/out.

    x_nchw : (N, C_in, H, W)
    w_dw   : (k, k, C_in)       depthwise weights
    w_pw   : (C_in, C_out)      pointwise 1x1 weights
    bn_*   : (C_out,)           folded eval-mode BatchNorm scale / bias
    """
    N, C_in, H, W = x_nchw.shape
    C_out = w_pw.shape[1]
    k, d, p = kernel_size, dilation, padding
    H_out = H + 2 * p - d * (k - 1)
    W_out = W + 2 * p - d * (k - 1)
    Hp, Wp = H + 2 * p, W + 2 * p

    # --- wrapper-side layout plumbing: spatial pad + flatten to (C, Hp*Wp) ---
    x_pad = jnp.pad(x_nchw.astype(jnp.float32),
                    ((0, 0), (0, 0), (p, p), (p, p)))
    x_flat = x_pad.reshape(N, C_in, Hp * Wp)

    L_out = _round_up(H_out * Wp, 128)            # lane-dense output width
    max_off = d * (k - 1) * (Wp + 1)              # largest tap offset
    L_in = max(Hp * Wp, max_off + L_out)
    if L_in > Hp * Wp:
        x_flat = jnp.pad(x_flat, ((0, 0), (0, 0), (0, L_in - Hp * Wp)))

    # --- fold depthwise + pointwise + BN scale into per-tap (C_out,C_in) ---
    w_tap = w_pw.T[None, None, :, :] * w_dw[:, :, None, :]      # (k,k,Co,Ci)
    w_tap = w_tap * bn_scale[None, None, :, None]
    w_tap = w_tap.reshape(k * k, C_out, C_in).astype(jnp.float32)
    bias = bn_bias.reshape(C_out, 1).astype(jnp.float32)

    kernel = functools.partial(_sepconv_bn_kernel, k=k, d=d, Wp=Wp,
                               L=L_out, apply_relu=apply_relu)
    y_flat = pl.pallas_call(
        kernel,
        out_shape=jax.ShapeDtypeStruct((N, C_out, L_out), jnp.float32),
        grid_spec=pltpu.PrefetchScalarGridSpec(
            num_scalar_prefetch=0,
            grid=(N,),
            in_specs=[
                pl.BlockSpec((1, C_in, L_in), lambda n: (n, 0, 0)),
                pl.BlockSpec((k * k, C_out, C_in), lambda n: (0, 0, 0)),
                pl.BlockSpec((C_out, 1), lambda n: (0, 0)),
            ],
            out_specs=pl.BlockSpec((1, C_out, L_out), lambda n: (n, 0, 0)),
        ),
        compiler_params=pltpu.CompilerParams(
            dimension_semantics=("parallel",),
            vmem_limit_bytes=64 * 1024 * 1024),
    )(x_flat, w_tap, bias)

    # --- un-flatten: flat position h*Wp + w holds output (h, w) for w < W_out
    y = y_flat[:, :, :H_out * Wp].reshape(N, C_out, H_out, Wp)[:, :, :, :W_out]
    return y


# ---------------------------------------------------------------------------
# Fused residual:  out = y + BN(1x1_conv(x))      (identity skip uses W = I)
# ---------------------------------------------------------------------------
def _skip_add_kernel(y_ref, x_ref, w_ref, b_ref, o_ref):
    skip = jnp.dot(w_ref[...], x_ref[0], preferred_element_type=jnp.float32)
    o_ref[0] = (y_ref[0] + skip + b_ref[...]).astype(o_ref.dtype)


def skip_add(y_nchw, x_nchw, w_skip, bn_scale, bn_bias):
    N, C_out, H, W = y_nchw.shape
    C_in = x_nchw.shape[1]
    HW = H * W
    HWp = _round_up(HW, 128)
    y_flat = y_nchw.reshape(N, C_out, HW).astype(jnp.float32)
    x_flat = x_nchw.reshape(N, C_in, HW).astype(jnp.float32)
    if HWp > HW:
        y_flat = jnp.pad(y_flat, ((0, 0), (0, 0), (0, HWp - HW)))
        x_flat = jnp.pad(x_flat, ((0, 0), (0, 0), (0, HWp - HW)))
    w = (w_skip * bn_scale[:, None]).astype(jnp.float32)        # fold BN scale
    b = bn_bias.reshape(C_out, 1).astype(jnp.float32)

    out = pl.pallas_call(
        _skip_add_kernel,
        out_shape=jax.ShapeDtypeStruct((N, C_out, HWp), jnp.float32),
        grid_spec=pltpu.PrefetchScalarGridSpec(
            num_scalar_prefetch=0,
            grid=(N,),
            in_specs=[
                pl.BlockSpec((1, C_out, HWp), lambda n: (n, 0, 0)),
                pl.BlockSpec((1, C_in, HWp), lambda n: (n, 0, 0)),
                pl.BlockSpec((C_out, C_in), lambda n: (0, 0)),
                pl.BlockSpec((C_out, 1), lambda n: (0, 0)),
            ],
            out_specs=pl.BlockSpec((1, C_out, HWp), lambda n: (n, 0, 0)),
        ),
        compiler_params=pltpu.CompilerParams(
            dimension_semantics=("parallel",),
            vmem_limit_bytes=64 * 1024 * 1024),
    )(y_flat, x_flat, w, b)
    return out[:, :, :HW].reshape(N, C_out, H, W)


# ---------------------------------------------------------------------------
# Block forward (eval-mode BatchNorm), mirroring the PyTorch module
# ---------------------------------------------------------------------------
def _bn_scale_bias(p, channels):
    if p is not None and "gamma" in p:
        s = p["gamma"] / jnp.sqrt(p["var"] + _BN_EPS)
        b = p["beta"] - p["mean"] * s
    else:
        s = jnp.ones((channels,), jnp.float32)
        b = jnp.zeros((channels,), jnp.float32)
    return s, b


def block_forward(x, params, *, strides=1, start_with_relu=True, with_bn=True):
    if strides != 1:
        # TODO(synk): strides != 1 (strided 1x1 skip conv + trailing
        # MaxPool2d(3, strides, 1)) is not implemented in the Pallas path.
        raise NotImplementedError("Block with strides != 1 not implemented")

    y = x
    for i, lp in enumerate(params["reps"]):
        outc = lp["w_pw"].shape[1]
        s, b = _bn_scale_bias(lp if with_bn else None, outc)
        y = separable_conv_bn(y, lp["w_dw"], lp["w_pw"], s, b,
                              kernel_size=3, padding=1, dilation=1,
                              apply_relu=(start_with_relu or i > 0))

    sp = params["skip"]
    c_out = y.shape[1]
    if sp is None:
        w_sk = jnp.eye(c_out, dtype=jnp.float32)      # identity skip
        s = jnp.ones((c_out,), jnp.float32)
        b = jnp.zeros((c_out,), jnp.float32)
    else:
        w_sk = sp["w"]
        s, b = _bn_scale_bias(sp if with_bn else None, c_out)
    return skip_add(y, x, w_sk, s, b)


def init_block_params(key, in_channels, out_channels, reps, *, strides=1,
                      grow_first=True, with_bn=True):
    keys = jax.random.split(key, 4 * reps + 4)
    ki = iter(range(len(keys)))
    rep_params = []
    for i in range(reps):
        if grow_first:
            inc = in_channels if i == 0 else out_channels
            outc = out_channels
        else:
            inc = in_channels
            outc = in_channels if i < reps - 1 else out_channels
        p = {
            "w_dw": 0.2 * jax.random.normal(keys[next(ki)], (3, 3, inc), jnp.float32),
            "w_pw": 0.2 * jax.random.normal(keys[next(ki)], (inc, outc), jnp.float32),
        }
        if with_bn:
            kg, kb = jax.random.split(keys[next(ki)])
            km, kv = jax.random.split(keys[next(ki)])
            p.update({
                "gamma": 1.0 + 0.1 * jax.random.normal(kg, (outc,), jnp.float32),
                "beta": 0.1 * jax.random.normal(kb, (outc,), jnp.float32),
                "mean": 0.1 * jax.random.normal(km, (outc,), jnp.float32),
                "var": jax.random.uniform(kv, (outc,), jnp.float32, 0.5, 1.5),
            })
        rep_params.append(p)

    skip = None
    if out_channels != in_channels or strides != 1:
        skip = {"w": 0.2 * jax.random.normal(
            keys[next(ki)], (out_channels, in_channels), jnp.float32)}
        if with_bn:
            kg, kb = jax.random.split(keys[next(ki)])
            km, kv = jax.random.split(keys[next(ki)])
            skip.update({
                "gamma": 1.0 + 0.1 * jax.random.normal(kg, (out_channels,), jnp.float32),
                "beta": 0.1 * jax.random.normal(kb, (out_channels,), jnp.float32),
                "mean": 0.1 * jax.random.normal(km, (out_channels,), jnp.float32),
                "var": jax.random.uniform(kv, (out_channels,), jnp.float32, 0.5, 1.5),
            })
    return {"reps": rep_params, "skip": skip}


# ---------------------------------------------------------------------------
# Pure-JAX reference mirroring the PyTorch module (eval mode)
# ---------------------------------------------------------------------------
def _block_reference(x, params, *, strides=1, start_with_relu=True, with_bn=True):
    def bn(z, p):
        s = p["gamma"] / jnp.sqrt(p["var"] + _BN_EPS)
        b = p["beta"] - p["mean"] * s
        return z * s[None, :, None, None] + b[None, :, None, None]

    y = x
    for i, lp in enumerate(params["reps"]):
        if start_with_relu or i > 0:
            y = jnp.maximum(y, 0.0)
        c_in = y.shape[1]
        w_dw = jnp.transpose(lp["w_dw"], (2, 0, 1))[:, None, :, :]   # (Ci,1,k,k)
        y = lax.conv_general_dilated(
            y, w_dw, window_strides=(1, 1), padding=[(1, 1), (1, 1)],
            rhs_dilation=(1, 1), feature_group_count=c_in,
            dimension_numbers=("NCHW", "OIHW", "NCHW"),
            precision=lax.Precision.HIGHEST)
        w_pw = jnp.transpose(lp["w_pw"], (1, 0))[:, :, None, None]    # (Co,Ci,1,1)
        y = lax.conv_general_dilated(
            y, w_pw, window_strides=(1, 1), padding=[(0, 0), (0, 0)],
            dimension_numbers=("NCHW", "OIHW", "NCHW"),
            precision=lax.Precision.HIGHEST)
        if with_bn:
            y = bn(y, lp)

    sp = params["skip"]
    if sp is None:
        skip = x
    else:
        skip = lax.conv_general_dilated(
            x, sp["w"][:, :, None, None], window_strides=(strides, strides),
            padding=[(0, 0), (0, 0)],
            dimension_numbers=("NCHW", "OIHW", "NCHW"),
            precision=lax.Precision.HIGHEST)
        if with_bn:
            skip = bn(skip, sp)
    return y + skip


if __name__ == "__main__":
    # Block(in_channels=4, out_channels=8, reps=2, strides=1,
    #       start_with_relu=True, grow_first=True, with_bn=True)
    N, H, W = 2, 16, 16
    in_channels, out_channels, reps = 4, 8, 2
    strides, start_with_relu, grow_first, with_bn = 1, True, True, True

    key = jax.random.PRNGKey(0)
    k_x, k_p = jax.random.split(key)
    x = jax.random.normal(k_x, (N, in_channels, H, W), dtype=jnp.float32)
    params = init_block_params(k_p, in_channels, out_channels, reps,
                               strides=strides, grow_first=grow_first,
                               with_bn=with_bn)

    out = block_forward(x, params, strides=strides,
                        start_with_relu=start_with_relu, with_bn=with_bn)
    out = jax.block_until_ready(out)

    ref = _block_reference(x, params, strides=strides,
                           start_with_relu=start_with_relu, with_bn=with_bn)
    np.testing.assert_allclose(np.asarray(out), np.asarray(ref),
                               rtol=2e-3, atol=2e-4)
    print("KERNEL_OK")
</pallas_src>

<mosaic_0001>
module attributes {stable_mosaic.version = 11 : i64} {
  func.func @_sepconv_bn_kernel(%arg0: i32, %arg1: memref<1x4x422xf32, #tpu.memory_space<vmem>>, %arg2: memref<9x8x4xf32, #tpu.memory_space<vmem>>, %arg3: memref<8x1xf32, #tpu.memory_space<vmem>>, %arg4: memref<1x8x384xf32, #tpu.memory_space<vmem>>) attributes {dimension_semantics = [#tpu.dimension_semantics<parallel>], iteration_bounds = array<i64: 2>, scalar_prefetch = 0 : i64, scratch_operands = 0 : i64, tpu.core_type = #tpu.core_type<tc>, window_params = [{transform_indices = @transform_0, window_bounds = array<i64: 1, 4, 422>}, {pipeline_mode = #tpu.pipeline_mode<synchronous>, transform_indices = @transform_1, window_bounds = array<i64: 9, 8, 4>}, {pipeline_mode = #tpu.pipeline_mode<synchronous>, transform_indices = @transform_2, window_bounds = array<i64: 8, 1>}, {transform_indices = @transform_3, window_bounds = array<i64: 1, 8, 384>}]} {
    %cst = arith.constant 0.000000e+00 : f32
    %0 = vector.broadcast %cst : f32 to vector<8x384xf32>
    %c0 = arith.constant 0 : index
    %c0_0 = arith.constant 0 : index
    %c0_1 = arith.constant 0 : index
    %1 = vector.load %arg1[%c0, %c0_0, %c0_1] : memref<1x4x422xf32, #tpu.memory_space<vmem>>, vector<1x4x384xf32>
    %2 = vector.shape_cast %1 : vector<1x4x384xf32> to vector<4x384xf32>
    %cst_2 = arith.constant 0.000000e+00 : f32
    %3 = vector.broadcast %cst_2 : f32 to vector<4x384xf32>
    %4 = arith.maximumf %2, %3 : vector<4x384xf32>
    %c0_3 = arith.constant 0 : index
    %c0_4 = arith.constant 0 : index
    %c0_5 = arith.constant 0 : index
    %5 = vector.load %arg2[%c0_3, %c0_4, %c0_5] : memref<9x8x4xf32, #tpu.memory_space<vmem>>, vector<1x8x4xf32>
    %6 = vector.shape_cast %5 : vector<1x8x4xf32> to vector<8x4xf32>
    %cst_6 = arith.constant dense<0.000000e+00> : vector<8x384xf32>
    %7 = tpu.matmul %6, %4, %cst_6 {dimension_numbers = #tpu.dot_dimension_numbers<[1], [0], [0], [1], [0, 0, 1, 1], [], []>} : vector<8x4xf32>, vector<4x384xf32>, vector<8x384xf32> -> vector<8x384xf32>
    %8 = arith.addf %0, %7 : vector<8x384xf32>
    %c0_7 = arith.constant 0 : index
    %c0_8 = arith.constant 0 : index
    %c1 = arith.constant 1 : index
    %9 = vector.load %arg1[%c0_7, %c0_8, %c1] : memref<1x4x422xf32, #tpu.memory_space<vmem>>, vector<1x4x384xf32>
    %10 = vector.shape_cast %9 : vector<1x4x384xf32> to vector<4x384xf32>
    %cst_9 = arith.constant 0.000000e+00 : f32
    %11 = vector.broadcast %cst_9 : f32 to vector<4x384xf32>
    %12 = arith.maximumf %10, %11 : vector<4x384xf32>
    %c1_10 = arith.constant 1 : index
    %c0_11 = arith.constant 0 : index
    %c0_12 = arith.constant 0 : index
    %13 = vector.load %arg2[%c1_10, %c0_11, %c0_12] : memref<9x8x4xf32, #tpu.memory_space<vmem>>, vector<1x8x4xf32>
    %14 = vector.shape_cast %13 : vector<1x8x4xf32> to vector<8x4xf32>
    %cst_13 = arith.constant dense<0.000000e+00> : vector<8x384xf32>
    %15 = tpu.matmul %14, %12, %cst_13 {dimension_numbers = #tpu.dot_dimension_numbers<[1], [0], [0], [1], [0, 0, 1, 1], [], []>} : vector<8x4xf32>, vector<4x384xf32>, vector<8x384xf32> -> vector<8x384xf32>
    %16 = arith.addf %8, %15 : vector<8x384xf32>
    %c0_14 = arith.constant 0 : index
    %c0_15 = arith.constant 0 : index
    %c2 = arith.constant 2 : index
    %17 = vector.load %arg1[%c0_14, %c0_15, %c2] : memref<1x4x422xf32, #tpu.memory_space<vmem>>, vector<1x4x384xf32>
    %18 = vector.shape_cast %17 : vector<1x4x384xf32> to vector<4x384xf32>
    %cst_16 = arith.constant 0.000000e+00 : f32
    %19 = vector.broadcast %cst_16 : f32 to vector<4x384xf32>
    %20 = arith.maximumf %18, %19 : vector<4x384xf32>
    %c2_17 = arith.constant 2 : index
    %c0_18 = arith.constant 0 : index
    %c0_19 = arith.constant 0 : index
    %21 = vector.load %arg2[%c2_17, %c0_18, %c0_19] : memref<9x8x4xf32, #tpu.memory_space<vmem>>, vector<1x8x4xf32>
    %22 = vector.shape_cast %21 : vector<1x8x4xf32> to vector<8x4xf32>
    %cst_20 = arith.constant dense<0.000000e+00> : vector<8x384xf32>
    %23 = tpu.matmul %22, %20, %cst_20 {dimension_numbers = #tpu.dot_dimension_numbers<[1], [0], [0], [1], [0, 0, 1, 1], [], []>} : vector<8x4xf32>, vector<4x384xf32>, vector<8x384xf32> -> vector<8x384xf32>
    %24 = arith.addf %16, %23 : vector<8x384xf32>
    %c0_21 = arith.constant 0 : index
    %c0_22 = arith.constant 0 : index
    %c18 = arith.constant 18 : index
    %25 = vector.load %arg1[%c0_21, %c0_22, %c18] : memref<1x4x422xf32, #tpu.memory_space<vmem>>, vector<1x4x384xf32>
    %26 = vector.shape_cast %25 : vector<1x4x384xf32> to vector<4x384xf32>
    %cst_23 = arith.constant 0.000000e+00 : f32
    %27 = vector.broadcast %cst_23 : f32 to vector<4x384xf32>
    %28 = arith.maximumf %26, %27 : vector<4x384xf32>
    %c3 = arith.constant 3 : index
    %c0_24 = arith.constant 0 : index
    %c0_25 = arith.constant 0 : index
    %29 = vector.load %arg2[%c3, %c0_24, %c0_25] : memref<9x8x4xf32, #tpu.memory_space<vmem>>, vector<1x8x4xf32>
    %30 = vector.shape_cast %29 : vector<1x8x4xf32> to vector<8x4xf32>
    %cst_26 = arith.constant dense<0.000000e+00> : vector<8x384xf32>
    %31 = tpu.matmul %30, %28, %cst_26 {dimension_numbers = #tpu.dot_dimension_numbers<[1], [0], [0], [1], [0, 0, 1, 1], [], []>} : vector<8x4xf32>, vector<4x384xf32>, vector<8x384xf32> -> vector<8x384xf32>
    %32 = arith.addf %24, %31 : vector<8x384xf32>
    %c0_27 = arith.constant 0 : index
    %c0_28 = arith.constant 0 : index
    %c19 = arith.constant 19 : index
    %33 = vector.load %arg1[%c0_27, %c0_28, %c19] : memref<1x4x422xf32, #tpu.memory_space<vmem>>, vector<1x4x384xf32>
    %34 = vector.shape_cast %33 : vector<1x4x384xf32> to vector<4x384xf32>
    %cst_29 = arith.constant 0.000000e+00 : f32
    %35 = vector.broadcast %cst_29 : f32 to vector<4x384xf32>
    %36 = arith.maximumf %34, %35 : vector<4x384xf32>
    %c4 = arith.constant 4 : index
    %c0_30 = arith.constant 0 : index
    %c0_31 = arith.constant 0 : index
    %37 = vector.load %arg2[%c4, %c0_30, %c0_31] : memref<9x8x4xf32, #tpu.memory_space<vmem>>, vector<1x8x4xf32>
    %38 = vector.shape_cast %37 : vector<1x8x4xf32> to vector<8x4xf32>
    %cst_32 = arith.constant dense<0.000000e+00> : vector<8x384xf32>
    %39 = tpu.matmul %38, %36, %cst_32 {dimension_numbers = #tpu.dot_dimension_numbers<[1], [0], [0], [1], [0, 0, 1, 1], [], []>} : vector<8x4xf32>, vector<4x384xf32>, vector<8x384xf32> -> vector<8x384xf32>
    %40 = arith.addf %32, %39 : vector<8x384xf32>
    %c0_33 = arith.constant 0 : index
    %c0_34 = arith.constant 0 : index
    %c20 = arith.constant 20 : index
    %41 = vector.load %arg1[%c0_33, %c0_34, %c20] : memref<1x4x422xf32, #tpu.memory_space<vmem>>, vector<1x4x384xf32>
    %42 = vector.shape_cast %41 : vector<1x4x384xf32> to vector<4x384xf32>
    %cst_35 = arith.constant 0.000000e+00 : f32
    %43 = vector.broadcast %cst_35 : f32 to vector<4x384xf32>
    %44 = arith.maximumf %42, %43 : vector<4x384xf32>
    %c5 = arith.constant 5 : index
    %c0_36 = arith.constant 0 : index
    %c0_37 = arith.constant 0 : index
    %45 = vector.load %arg2[%c5, %c0_36, %c0_37] : memref<9x8x4xf32, #tpu.memory_space<vmem>>, vector<1x8x4xf32>
    %46 = vector.shape_cast %45 : vector<1x8x4xf32> to vector<8x4xf32>
    %cst_38 = arith.constant dense<0.000000e+00> : vector<8x384xf32>
    %47 = tpu.matmul %46, %44, %cst_38 {dimension_numbers = #tpu.dot_dimension_numbers<[1], [0], [0], [1], [0, 0, 1, 1], [], []>} : vector<8x4xf32>, vector<4x384xf32>, vector<8x384xf32> -> vector<8x384xf32>
    %48 = arith.addf %40, %47 : vector<8x384xf32>
    %c0_39 = arith.constant 0 : index
    %c0_40 = arith.constant 0 : index
    %c36 = arith.constant 36 : index
    %49 = vector.load %arg1[%c0_39, %c0_40, %c36] : memref<1x4x422xf32, #tpu.memory_space<vmem>>, vector<1x4x384xf32>
    %50 = vector.shape_cast %49 : vector<1x4x384xf32> to vector<4x384xf32>
    %cst_41 = arith.constant 0.000000e+00 : f32
    %51 = vector.broadcast %cst_41 : f32 to vector<4x384xf32>
    %52 = arith.maximumf %50, %51 : vector<4x384xf32>
    %c6 = arith.constant 6 : index
    %c0_42 = arith.constant 0 : index
    %c0_43 = arith.constant 0 : index
    %53 = vector.load %arg2[%c6, %c0_42, %c0_43] : memref<9x8x4xf32, #tpu.memory_space<vmem>>, vector<1x8x4xf32>
    %54 = vector.shape_cast %53 : vector<1x8x4xf32> to vector<8x4xf32>
    %cst_44 = arith.constant dense<0.000000e+00> : vector<8x384xf32>
    %55 = tpu.matmul %54, %52, %cst_44 {dimension_numbers = #tpu.dot_dimension_numbers<[1], [0], [0], [1], [0, 0, 1, 1], [], []>} : vector<8x4xf32>, vector<4x384xf32>, vector<8x384xf32> -> vector<8x384xf32>
    %56 = arith.addf %48, %55 : vector<8x384xf32>
    %c0_45 = arith.constant 0 : index
    %c0_46 = arith.constant 0 : index
    %c37 = arith.constant 37 : index
    %57 = vector.load %arg1[%c0_45, %c0_46, %c37] : memref<1x4x422xf32, #tpu.memory_space<vmem>>, vector<1x4x384xf32>
    %58 = vector.shape_cast %57 : vector<1x4x384xf32> to vector<4x384xf32>
    %cst_47 = arith.constant 0.000000e+00 : f32
    %59 = vector.broadcast %cst_47 : f32 to vector<4x384xf32>
    %60 = arith.maximumf %58, %59 : vector<4x384xf32>
    %c7 = arith.constant 7 : index
    %c0_48 = arith.constant 0 : index
    %c0_49 = arith.constant 0 : index
    %61 = vector.load %arg2[%c7, %c0_48, %c0_49] : memref<9x8x4xf32, #tpu.memory_space<vmem>>, vector<1x8x4xf32>
    %62 = vector.shape_cast %61 : vector<1x8x4xf32> to vector<8x4xf32>
    %cst_50 = arith.constant dense<0.000000e+00> : vector<8x384xf32>
    %63 = tpu.matmul %62, %60, %cst_50 {dimension_numbers = #tpu.dot_dimension_numbers<[1], [0], [0], [1], [0, 0, 1, 1], [], []>} : vector<8x4xf32>, vector<4x384xf32>, vector<8x384xf32> -> vector<8x384xf32>
    %64 = arith.addf %56, %63 : vector<8x384xf32>
    %c0_51 = arith.constant 0 : index
    %c0_52 = arith.constant 0 : index
    %c38 = arith.constant 38 : index
    %65 = vector.load %arg1[%c0_51, %c0_52, %c38] : memref<1x4x422xf32, #tpu.memory_space<vmem>>, vector<1x4x384xf32>
    %66 = vector.shape_cast %65 : vector<1x4x384xf32> to vector<4x384xf32>
    %cst_53 = arith.constant 0.000000e+00 : f32
    %67 = vector.broadcast %cst_53 : f32 to vector<4x384xf32>
    %68 = arith.maximumf %66, %67 : vector<4x384xf32>
    %c8 = arith.constant 8 : index
    %c0_54 = arith.constant 0 : index
    %c0_55 = arith.constant 0 : index
    %69 = vector.load %arg2[%c8, %c0_54, %c0_55] : memref<9x8x4xf32, #tpu.memory_space<vmem>>, vector<1x8x4xf32>
    %70 = vector.shape_cast %69 : vector<1x8x4xf32> to vector<8x4xf32>
    %cst_56 = arith.constant dense<0.000000e+00> : vector<8x384xf32>
    %71 = tpu.matmul %70, %68, %cst_56 {dimension_numbers = #tpu.dot_dimension_numbers<[1], [0], [0], [1], [0, 0, 1, 1], [], []>} : vector<8x4xf32>, vector<4x384xf32>, vector<8x384xf32> -> vector<8x384xf32>
    %72 = arith.addf %64, %71 : vector<8x384xf32>
    %c0_57 = arith.constant 0 : index
    %c0_58 = arith.constant 0 : index
    %73 = vector.load %arg3[%c0_57, %c0_58] : memref<8x1xf32, #tpu.memory_space<vmem>>, vector<8x1xf32>
    %74 = vector.broadcast %73 : vector<8x1xf32> to vector<8x384xf32>
    %75 = arith.addf %72, %74 : vector<8x384xf32>
    %c0_59 = arith.constant 0 : index
    %c0_60 = arith.constant 0 : index
    %c0_61 = arith.constant 0 : index
    %76 = vector.load %arg4[%c0_59, %c0_60, %c0_61] : memref<1x8x384xf32, #tpu.memory_space<vmem>>, vector<1x8x384xf32>
    %77 = vector.shape_cast %76 : vector<1x8x384xf32> to vector<8x384xf32>
    %78 = vector.shape_cast %75 : vector<8x384xf32> to vector<1x8x384xf32>
    tpu.vector_store %arg4[%c0_59, %c0_60, %c0_61], %78 {strides = array<i32>} : memref<1x8x384xf32, #tpu.memory_space<vmem>>, vector<1x8x384xf32>,
    return
  }
  func.func @transform_0(%arg0: i32) -> (i32, i32, i32) {
    %c0_i32 = arith.constant 0 : i32
    %c0_i32_0 = arith.constant 0 : i32
    %c0_i32_1 = arith.constant 0 : i32
    return %arg0, %c0_i32, %c0_i32_0 : i32, i32, i32
  }
  func.func @transform_1(%arg0: i32) -> (i32, i32, i32) {
    %c0_i32 = arith.constant 0 : i32
    %c0_i32_0 = arith.constant 0 : i32
    %c0_i32_1 = arith.constant 0 : i32
    %c0_i32_2 = arith.constant 0 : i32
    return %c0_i32, %c0_i32_0, %c0_i32_1 : i32, i32, i32
  }
  func.func @transform_2(%arg0: i32) -> (i32, i32) {
    %c0_i32 = arith.constant 0 : i32
    %c0_i32_0 = arith.constant 0 : i32
    %c0_i32_1 = arith.constant 0 : i32
    return %c0_i32, %c0_i32_0 : i32, i32
  }
  func.func @transform_3(%arg0: i32) -> (i32, i32, i32) {
    %c0_i32 = arith.constant 0 : i32
    %c0_i32_0 = arith.constant 0 : i32
    %c0_i32_1 = arith.constant 0 : i32
    return %arg0, %c0_i32, %c0_i32_0 : i32, i32, i32
  }
}

</mosaic_0001>

<bundles_post_ra>
// kernel: tpu_custom_call.1
= control target key start
LH: loop header
LB: loop body
LE: loop exit
PB: predicated region body
PF: predicated region fallthrough
CT: control target
= control target key end

     0   :  { %8 = vsyncpa [#allocation3], 0  ;;  %s2310_s0 = inlined_call_operand.vmem [shape: f32[2,4,422], index: 0, kind: input, shape index: {}]   ;;  %s2311_s1 = inlined_call_operand.vmem [shape: f32[9,8,4], index: 1, kind: input, shape index: {}]   ;;  %s2312_s2 = inlined_call_operand.vmem [shape: f32[8,1], index: 2, kind: input, shape index: {}]   ;;  %s2313_s3 = inlined_call_operand.hbm [shape: f32[2,8,384], index: 3, kind: output, shape index: {}]  }
   0x1   :  { %10 = vsyncpa [#allocation3 + $0x1], 0  ;;  %s2081_s12 = smov 0   ;;  %s2083_s13 = smov 0  }
   0x2   :  { %s2085_s14 = smov 0   ;;  %s2087_s15 = smov 0  }
   0x3 LB: > { %s2102_s16 = sadd.s32 4294967295, %s2047_s15   ;;  %s1808_s17 = sadd.s32 4294967294, %s2047_s15   ;;  %s2047_s15 = sphi %s2087_s15, %s2319_s15   ;;  %s2043_s14 = sphi %s2085_s14, %s2318_s14   ;;  %s2039_s13 = sphi %s2083_s13, %s2317_s13   ;;  %s2035_s12 = sphi %s2081_s12, %s2316_s12  }
   0x4   : > { %s2106_s18 = sadd.s32 1, %s2047_s15   ;;  %s91_s19 = sadd.s32 1, %s2043_s14 }
   0x5   : > { %s88_s20 = ssub.s32 %s2047_s15, %s2106_s18  ;;  %p101_p0 = scmp.ne.s32.totalorder %s2043_s14, %s2039_s13 }
   0x6   : > { %p89_p1 = scmp.eq.s32.totalorder %s88_s20, 0  ;;  %p102_p2 = scmp.eq.s32.totalorder %s2102_s16, 1 }
   0x7   : > { %p107_p3 = scmp.ne.s32.totalorder %s2039_s13, %s2035_s12  ;;  %p108_p4 = scmp.eq.s32.totalorder %s1808_s17, 1 }
   0x8   : > { %s2117_s21 = scalar_select %p89_p1, %s2043_s14, %s91_s19  }
   0x9   : > { %p2119_p5 = por %p102_p2, %p101_p0  ;;  %p2123_p6 = por %p108_p4, %p107_p3 }
   0xa   : > { %p1811_p7 = scmp.ge.s32.totalorder %s2047_s15, 1  ;;  %p140_p8 = scmp.lt.s32.totalorder %s2047_s15, 3 }
   0xc   : > { %p141_p9 = pnand %p1811_p7, %p140_p8 }
   0xd   : > { %p164_p10 = scmp.lt.s32.totalorder (!%p141_p9), %s2102_s16, 1  ;;  %s2051_s29 = smov (!%p141_p9), 127  }
   0xe   : > { %144 = sbr.rel (%p141_p9) target bundleno = 415 (0x19f), region = 32  ;;  %s2052_s30 = smov (!%p141_p9), 126  }
   0xf   : > { %s2053_s4 = smov (!%p141_p9), 110   ;;  %s2054_s5 = smov (!%p141_p9), 109  }
  0x10   : > { %s2055_s6 = smov (!%p141_p9), 108   ;;  %s2056_s7 = smov (!%p141_p9), 92  }
  0x11   : > { %s2057_s8 = smov (!%p141_p9), 91   ;;  %s2059_s9 = smov (!%p141_p9), 90  }
  0x12   : > { %s161_s17 = sand.u32 (!%p141_p9), 1, %s2039_s13   ;;  %s1935_s20 = smul.u32 (!%p141_p9), 384, %s2102_s16 }
  0x13   : > { %s165_s24 = scalar_select %p164_p10, %s2102_s16, 1  ;;  %v2049_v0 = vmov 0.0   ;;  %vm2050_vm0 = vmmov 0   ;;  %v2058_v7 = vmov 0   ;;  %v1722_v8 = vld [vmem:[%s2312_s2] sm:$0xff]  ;;  %vm190_vm1 = vcmask 1039360  }
  0x14   : > { %269 = vmatprep.mubr.f32.mxu0 %v2049_v0  ;;  %1889 = vmatprep.subr.mxu1 %v2049_v0  ;;  %vm198_vm2 = vcmask 1043456   ;;  %v1814_v15 = vld [vmem:[%s2311_s1 + $0x8] sm:$0xff]  ;;  %vm194_vm3 = vcmask 31744   ;;  %vm515_vm4 = vcmask 1031168   ;;  %v173_v22 = vld [vmem:[%s2311_s1] sm:$0xff]  ;;  %vm690_vm5 = vcmask 900096  }
  0x15   : > { %s1870_s25 = sshll.u32 %s165_s24, 4  ;;  %1891 = vmatprep.mubr.msk.f32.mxu1 %vm2050_vm0, %v2049_v0  ;;  %1986 = vset.pattern.permute.xlu0 %v2058_v7  ;;  %v1825_v27 = vld [vmem:[%s2311_s1 + $0x10] sm:$0xff]  ;;  %v1831_v33 = vld [vmem:[%s2311_s1 + $0x18] sm:$0xff]  ;;  %vm865_vm6 = vcmask 891904   ;;  %v1837_v41 = vld [vmem:[%s2311_s1 + $0x20] sm:$0xff]  ;;  %vm1040_vm7 = vcmask 883712  }
  0x16   : > { %s2136_s28 = scalar_lea.vmem %s2310_s0, %s1870_s25  ;;  %v1843_v49 = vld [vmem:[%s2311_s1 + $0x28] sm:$0xff]  ;;  %vm1215_vm8 = vcmask 752640   ;;  %v1849_v57 = vld [vmem:[%s2311_s1 + $0x30] sm:$0xff]  ;;  %vm1390_vm9 = vcmask 744448   ;;  %vm1565_vm10 = vcmask 736256   ;;  %s1934_s19 = smul.u32 24, %s161_s17 }
  0x17   : > { %v174_v1 = vld [vmem:[%s2136_s28 + $0x8] sm:$0xff]  ;;  %v169_v2 = vld [vmem:[%s2136_s28] sm:$0xff] }
  0x18   : > { %v175_v3 = vmax.f32 %v174_v1, 0.0  ;;  %v2142_v4 = vmax.f32 %v169_v2, 0.0  ;;  %v170_v16 = vld [vmem:[%s2136_s28 + $0x8] sm:$0xf]  ;;  %v1855_v2 = vld [vmem:[%s2311_s1 + $0x38] sm:$0xff]  ;;  %s163_s24 = scalar_lea.vmem [#allocation2], %s1934_s19  ;;  %s1747_s28 = scalar_lea.hbm %s2313_s3, %s1935_s20 }
  0x19   : > { %v172_v19 = vmax.f32 %v170_v16, 0.0  ;;  %s1749_s25 = sshll.u32 %s163_s24, 4  ;;  %s1750_s25 = int_to_ptr.vmem [resolvable:$true] %s1749_s25 }
  0x1a   : > { %186 = vrot.lane.b32.xlu0 %v175_v3, %s2051_s29  ;;  %182 = vrot.lane.b32.xlu1 %v2142_v4, %s2051_s29  ;;  %v180_v5 = vcombine.high %v2142_v4, %v2142_v4  ;;  %v181_v6 = vcombine.high %v175_v3, %v175_v3  ;;  %s1987_s16 = scalar_lea.vmem %s1750_s25, 384 }
  0x1b   : > { %p1988_p11 = scmp.ne.s32.totalorder %s1750_s25, %s1987_s16 }
  0x1d   : > { %p1989_p12 = pnand %p1988_p11, %p2119_p5 }
  0x1e   : > { %511 = vrot.lane.b32.xlu1 %v175_v3, %s2052_s30  ;;  %184 = vrot.lane.b32.xlu0 %v180_v5, %s2051_s29 }
  0x1f   : > { %p1990_p13 = pneg %p1989_p12 }
  0x22   : > { %188 = vrot.lane.b32.xlu1 %v181_v6, %s2051_s29  ;;  %509 = vrot.lane.b32.xlu0 %v180_v5, %s2052_s30  ;;  %s1735_s29 = scalar_lea.sflag [#allocation3], %s161_s17 }
  0x26   : > { %513 = vrot.lane.b32.xlu1 %v181_v6, %s2052_s30  ;;  %507 = vrot.lane.b32.xlu0 %v2142_v4, %s2052_s30  ;;  %s2060_s30 = smov [#allocation2]  }
  0x2a   : > { %686 = vrot.lane.b32.xlu1 %v175_v3, %s2053_s4  ;;  %684 = vrot.lane.b32.xlu0 %v180_v5, %s2053_s4 }
  0x2e   : > { %688 = vrot.lane.b32.xlu1 %v181_v6, %s2053_s4  ;;  %682 = vrot.lane.b32.xlu0 %v2142_v4, %s2053_s4  ;;  %s1991_s4 = sshll.u32 %s2060_s30, 4  ;;  %s1992_s4 = int_to_ptr.vmem [resolvable:$false] %s1991_s4 }
  0x2f   : > { %p1994_p0 = scmp.lt.s32.totalorder %s1750_s25, %s1992_s4 }
  0x32   : > { %861 = vrot.lane.b32.xlu1 %v175_v3, %s2054_s5  ;;  %859 = vrot.lane.b32.xlu0 %v180_v5, %s2054_s5 }
  0x36   : > { %863 = vrot.lane.b32.xlu1 %v181_v6, %s2054_s5  ;;  %857 = vrot.lane.b32.xlu0 %v2142_v4, %s2054_s5  ;;  %s1993_s5 = scalar_lea.vmem %s1992_s4, 768 }
  0x37   : > { %p1995_p1 = scmp.lt.s32.totalorder %s1993_s5, %s1987_s16 }
  0x39   : > { %p1996_p2 = por %p1995_p1, %p1994_p0 }
  0x3a   : > { %1036 = vrot.lane.b32.xlu1 %v175_v3, %s2055_s6  ;;  %1034 = vrot.lane.b32.xlu0 %v180_v5, %s2055_s6 }
  0x3b   : > { %p1997_p3 = pnand %p1996_p2, %p1990_p13 }
  0x3e   : > { %1038 = vrot.lane.b32.xlu1 %v181_v6, %s2055_s6  ;;  %1032 = vrot.lane.b32.xlu0 %v2142_v4, %s2055_s6 }
  0x42   : > { %1211 = vrot.lane.b32.xlu1 %v175_v3, %s2056_s7  ;;  %1209 = vrot.lane.b32.xlu0 %v180_v5, %s2056_s7 }
  0x46   : > { %1213 = vrot.lane.b32.xlu1 %v181_v6, %s2056_s7  ;;  %1207 = vrot.lane.b32.xlu0 %v2142_v4, %s2056_s7 }
  0x4a   : > { %1386 = vrot.lane.b32.xlu1 %v175_v3, %s2057_s8  ;;  %1384 = vrot.lane.b32.xlu0 %v180_v5, %s2057_s8 }
  0x4e   : > { %1388 = vrot.lane.b32.xlu1 %v181_v6, %s2057_s8  ;;  %1382 = vrot.lane.b32.xlu0 %v2142_v4, %s2057_s8 }
  0x52   : > { %1561 = vrot.lane.b32.xlu1 %v175_v3, %s2059_s9  ;;  %1559 = vrot.lane.b32.xlu0 %v180_v5, %s2059_s9 }
  0x56   : > { %1563 = vrot.lane.b32.xlu1 %v181_v6, %s2059_s9  ;;  %1557 = vrot.lane.b32.xlu0 %v2142_v4, %s2059_s9 }
  0x5a   : > { %1725 = vperm.xlu0 %1986, %v1722_v8  }
  0x8c   : > { %v187_v9 = vpop.permute.xlu0 %186  ;;  %v183_v10 = vpop.permute.xlu1 %182 }
  0x90   : > { %v512_v11 = vpop.permute.xlu1 %511  ;;  %v185_v12 = vpop.permute.xlu0 %184 }
  0x91   : > { %v192_v13 = vsel %vm190_vm1, %v185_v12, %v187_v9  ;;  %v191_v14 = vsel %vm190_vm1, %v183_v10, %v185_v12  ;;  %v1861_v10 = vld [vmem:[%s2311_s1 + $0x40] sm:$0xff] }
  0x92   : > { %1815 = vmatprep.subr.msk.mxu0 %vm198_vm2, %v192_v13 }
  0x93   : > { %1816 = vmatpush1.msk.msra.mxu0 %vm198_vm2, %v191_v14 }
  0x94   : > { %v189_v17 = vpop.permute.xlu1 %188  ;;  %1820 = vmatprep.subr.msk.mxu0 %vm198_vm2, %v180_v5  ;;  %v510_v18 = vpop.permute.xlu0 %509  ;;  %1817 = vmatmul.mubr.msk.f32.vlgmr.msra.gmra.mxu0 %vm194_vm3, %v1814_v15 }
  0x95   : > { %v517_v20 = vsel %vm515_vm4, %v510_v18, %v512_v11  ;;  %1821 = vmatpush1.msk.msra.mxu0 %vm198_vm2, %v2142_v4  ;;  %v193_v21 = vsel %vm190_vm1, %v187_v9, %v189_v17  ;;  %420 = vmatprep.mubr.f32.mxu0 %v2049_v0 }
  0x96   : > { %1890 = vmatpush3.msk.msra.mxu1 %vm198_vm2, %v193_v21  ;;  %1826 = vmatprep.subr.msk.mxu0 %vm198_vm2, %v517_v20 }
  0x97   : > { %1892 = vmatmul.mubr.msk.f32.vlgmr.msra.gmra.mxu1 %vm194_vm3, %v1814_v15  ;;  %1894 = vmatprep.subr.mxu1 %v2049_v0 }
  0x98   : > { %v514_v23 = vpop.permute.xlu1 %513  ;;  %v508_v24 = vpop.permute.xlu0 %507  ;;  %1895 = vmatpush3.msk.msra.mxu1 %vm198_vm2, %v172_v19  ;;  %1822 = vmatmul.mubr.msk.f32.vlgmr.msra.gmra.mxu0 %vm194_vm3, %v173_v22 }
  0x99   : > { %v518_v25 = vsel %vm515_vm4, %v512_v11, %v514_v23  ;;  %v516_v26 = vsel %vm515_vm4, %v508_v24, %v510_v18  ;;  %1896 = vmatprep.mubr.msk.f32.mxu1 %vm2050_vm0, %v2049_v0  ;;  %1899 = vmatprep.subr.mxu1 %v2049_v0 }
  0x9a   : > { %1827 = vmatpush1.msk.msra.mxu0 %vm198_vm2, %v516_v26  ;;  %592 = vmatprep.mubr.f32.mxu0 %v2049_v0 }
  0x9b   : > { %1897 = vmatmul.mubr.msk.f32.vlgmr.msra.gmra.mxu1 %vm194_vm3, %v173_v22 }
  0x9c   : > { %1900 = vmatpush3.msk.msra.mxu1 %vm198_vm2, %v518_v25  ;;  %v687_v28 = vpop.permute.xlu1 %686  ;;  %v685_v29 = vpop.permute.xlu0 %684  ;;  %1901 = vmatprep.mubr.msk.f32.mxu1 %vm2050_vm0, %v2049_v0 }
  0x9d   : > { %v692_v30 = vsel %vm690_vm5, %v685_v29, %v687_v28  ;;  %1904 = vmatprep.subr.mxu1 %v2049_v0  ;;  %1828 = vmatmul.mubr.msk.f32.vlgmr.msra.gmra.mxu0 %vm194_vm3, %v1825_v27 }
  0x9e   : > { %1832 = vmatprep.subr.msk.mxu0 %vm198_vm2, %v692_v30  ;;  %767 = vmatprep.mubr.f32.mxu0 %v2049_v0 }
  0x9f   : > { %1902 = vmatmul.mubr.msk.f32.vlgmr.msra.gmra.mxu1 %vm194_vm3, %v1825_v27 }
  0xa0   : > { %v689_v31 = vpop.permute.xlu1 %688  ;;  %v683_v32 = vpop.permute.xlu0 %682  ;;  %1906 = vmatprep.mubr.msk.f32.mxu1 %vm2050_vm0, %v2049_v0 }
  0xa1   : > { %v693_v34 = vsel %vm690_vm5, %v687_v28, %v689_v31  ;;  %v691_v35 = vsel %vm690_vm5, %v683_v32, %v685_v29 }
  0xa2   : > { %1833 = vmatpush1.msk.msra.mxu0 %vm198_vm2, %v691_v35  ;;  %1905 = vmatpush3.msk.msra.mxu1 %vm198_vm2, %v693_v34 }
  0xa3   : > { %1909 = vmatprep.subr.mxu1 %v2049_v0  ;;  %1834 = vmatmul.mubr.msk.f32.vlgmr.msra.gmra.mxu0 %vm194_vm3, %v1831_v33 }
  0xa4   : > { %v862_v36 = vpop.permute.xlu1 %861  ;;  %v860_v37 = vpop.permute.xlu0 %859  ;;  %1907 = vmatmul.mubr.msk.f32.vlgmr.msra.gmra.mxu1 %vm194_vm3, %v1831_v33  ;;  %942 = vmatprep.mubr.f32.mxu0 %v2049_v0 }
  0xa5   : > { %v867_v38 = vsel %vm865_vm6, %v860_v37, %v862_v36  ;;  %1911 = vmatprep.mubr.msk.f32.mxu1 %vm2050_vm0, %v2049_v0 }
  0xa6   : > { %1838 = vmatprep.subr.msk.mxu0 %vm198_vm2, %v867_v38 }
  0xa8   : > { %v864_v39 = vpop.permute.xlu1 %863  ;;  %v858_v40 = vpop.permute.xlu0 %857 }
  0xa9   : > { %v868_v42 = vsel %vm865_vm6, %v862_v36, %v864_v39  ;;  %v866_v43 = vsel %vm865_vm6, %v858_v40, %v860_v37 }
  0xaa   : > { %1839 = vmatpush1.msk.msra.mxu0 %vm198_vm2, %v866_v43  ;;  %1910 = vmatpush3.msk.msra.mxu1 %vm198_vm2, %v868_v42 }
  0xab   : > { %1840 = vmatmul.mubr.msk.f32.vlgmr.msra.gmra.mxu0 %vm194_vm3, %v1837_v41  ;;  %1914 = vmatprep.subr.mxu1 %v2049_v0 }
  0xac   : > { %v1037_v44 = vpop.permute.xlu1 %1036  ;;  %v1035_v45 = vpop.permute.xlu0 %1034  ;;  %1912 = vmatmul.mubr.msk.f32.vlgmr.msra.gmra.mxu1 %vm194_vm3, %v1837_v41  ;;  %1117 = vmatprep.mubr.f32.mxu0 %v2049_v0 }
  0xad   : > { %v1042_v46 = vsel %vm1040_vm7, %v1035_v45, %v1037_v44  ;;  %1916 = vmatprep.mubr.msk.f32.mxu1 %vm2050_vm0, %v2049_v0 }
  0xae   : > { %1844 = vmatprep.subr.msk.mxu0 %vm198_vm2, %v1042_v46 }
  0xb0   : > { %v1039_v47 = vpop.permute.xlu1 %1038  ;;  %v1033_v48 = vpop.permute.xlu0 %1032 }
  0xb1   : > { %v1043_v50 = vsel %vm1040_vm7, %v1037_v44, %v1039_v47  ;;  %v1041_v51 = vsel %vm1040_vm7, %v1033_v48, %v1035_v45 }
  0xb2   : > { %1845 = vmatpush1.msk.msra.mxu0 %vm198_vm2, %v1041_v51  ;;  %1915 = vmatpush3.msk.msra.mxu1 %vm198_vm2, %v1043_v50 }
  0xb3   : > { %1846 = vmatmul.mubr.msk.f32.vlgmr.msra.gmra.mxu0 %vm194_vm3, %v1843_v49  ;;  %1917 = vmatmul.mubr.msk.f32.vlgmr.msra.gmra.mxu1 %vm194_vm3, %v1843_v49 }
  0xb4   : > { %v1212_v52 = vpop.permute.xlu1 %1211  ;;  %v1210_v53 = vpop.permute.xlu0 %1209  ;;  %1919 = vmatprep.subr.mxu1 %v2049_v0  ;;  %1292 = vmatprep.mubr.f32.mxu0 %v2049_v0 }
  0xb5   : > { %v1217_v54 = vsel %vm1215_vm8, %v1210_v53, %v1212_v52  ;;  %1921 = vmatprep.mubr.msk.f32.mxu1 %vm2050_vm0, %v2049_v0 }
  0xb6   : > { %1850 = vmatprep.subr.msk.mxu0 %vm198_vm2, %v1217_v54 }
  0xb8   : > { %v1214_v55 = vpop.permute.xlu1 %1213  ;;  %v1208_v56 = vpop.permute.xlu0 %1207 }
  0xb9   : > { %v1218_v58 = vsel %vm1215_vm8, %v1212_v52, %v1214_v55  ;;  %v1216_v59 = vsel %vm1215_vm8, %v1208_v56, %v1210_v53 }
  0xba   : > { %1851 = vmatpush1.msk.msra.mxu0 %vm198_vm2, %v1216_v59  ;;  %1920 = vmatpush3.msk.msra.mxu1 %vm198_vm2, %v1218_v58 }
  0xbb   : > { %1852 = vmatmul.mubr.msk.f32.vlgmr.msra.gmra.mxu0 %vm194_vm3, %v1849_v57  ;;  %1922 = vmatmul.mubr.msk.f32.vlgmr.msra.gmra.mxu1 %vm194_vm3, %v1849_v57 }
  0xbc   : > { %v1387_v60 = vpop.permute.xlu1 %1386  ;;  %v1385_v61 = vpop.permute.xlu0 %1384  ;;  %1924 = vmatprep.subr.mxu1 %v2049_v0  ;;  %1467 = vmatprep.mubr.f32.mxu0 %v2049_v0 }
  0xbd   : > { %v1392_v62 = vsel %vm1390_vm9, %v1385_v61, %v1387_v60  ;;  %1926 = vmatprep.mubr.msk.f32.mxu1 %vm2050_vm0, %v2049_v0 }
  0xbe   : > { %1856 = vmatprep.subr.msk.mxu0 %vm198_vm2, %v1392_v62 }
  0xc0   : > { %v1389_v63 = vpop.permute.xlu1 %1388  ;;  %v1383_v1 = vpop.permute.xlu0 %1382 }
  0xc1   : > { %v1393_v3 = vsel %vm1390_vm9, %v1387_v60, %v1389_v63  ;;  %v1391_v4 = vsel %vm1390_vm9, %v1383_v1, %v1385_v61 }
  0xc2   : > { %1857 = vmatpush1.msk.msra.mxu0 %vm198_vm2, %v1391_v4  ;;  %1925 = vmatpush3.msk.msra.mxu1 %vm198_vm2, %v1393_v3 }
  0xc3   : > { %1858 = vmatmul.mubr.msk.f32.vlgmr.msra.gmra.mxu0 %vm194_vm3, %v1855_v2  ;;  %1927 = vmatmul.mubr.msk.f32.vlgmr.msra.gmra.mxu1 %vm194_vm3, %v1855_v2 }
  0xc4   : > { %v1562_v5 = vpop.permute.xlu1 %1561  ;;  %v1560_v6 = vpop.permute.xlu0 %1559  ;;  %1929 = vmatprep.subr.mxu1 %v2049_v0  ;;  %1642 = vmatprep.mubr.f32.mxu0 %v2049_v0 }
  0xc5   : > { %v1567_v7 = vsel %vm1565_vm10, %v1560_v6, %v1562_v5  ;;  %1931 = vmatprep.mubr.msk.f32.mxu1 %vm2050_vm0, %v2049_v0 }
  0xc6   : > { %1862 = vmatprep.subr.msk.mxu0 %vm198_vm2, %v1567_v7 }
  0xc8   : > { %v1564_v8 = vpop.permute.xlu1 %1563  ;;  %v1558_v9 = vpop.permute.xlu0 %1557 }
  0xc9   : > { %v1568_v11 = vsel %vm1565_vm10, %v1562_v5, %v1564_v8  ;;  %v1566_v12 = vsel %vm1565_vm10, %v1558_v9, %v1560_v6 }
  0xca   : > { %1863 = vmatpush1.msk.msra.mxu0 %vm198_vm2, %v1566_v12  ;;  %1930 = vmatpush3.msk.msra.mxu1 %vm198_vm2, %v1568_v11 }
  0xcb   : > { %1864 = vmatmul.mubr.msk.f32.vlgmr.msra.gmra.mxu0 %vm194_vm3, %v1861_v10  ;;  %1932 = vmatmul.mubr.msk.f32.vlgmr.msra.gmra.mxu1 %vm194_vm3, %v1861_v10 }
  0xd5   : > { %v1726_v1 = vpop.permute.xlu0 %1725 }
 0x154   : > { %v271_v13 = vpop.f32.mrf.mxu0 }
 0x156   : > { %v273_v0 = vpop.f32.mrf.mxu0 }
 0x157   : > { %v342_v14 = vpop.f32.mrf.mxu1 }
 0x158   : > { %v422_v15 = vpop.f32.mrf.mxu0 }
 0x159   : > { %v1893_v16 = vpop.f32.mrf.mxu1  ;;  %v423_v34 = vadd.f32 %v422_v15, %v271_v13 }
 0x15a   : > { %v424_v18 = vpop.f32.mrf.mxu0 }
 0x15b   : > { %v493_v17 = vpop.f32.mrf.mxu1  ;;  %v425_v37 = vadd.f32 %v424_v18, %v273_v0 }
 0x15c   : > { %v494_v35 = vadd.f32 %v493_v17, %v342_v14 }
 0x15d   : > { %v1898_v19 = vpop.f32.mrf.mxu1  ;;  %v594_v21 = vpop.f32.mrf.mxu0 }
 0x15e   : > { %v669_v38 = vadd.f32 %v594_v21, %v423_v34 }
 0x15f   : > { %v665_v20 = vpop.f32.mrf.mxu1  ;;  %v596_v24 = vpop.f32.mrf.mxu0 }
 0x160   : > { %v671_v39 = vadd.f32 %v665_v20, %v494_v35  ;;  %v670_v43 = vadd.f32 %v596_v24, %v425_v37 }
 0x161   : > { %v1903_v22 = vpop.f32.mrf.mxu1 }
 0x163   : > { %v769_v26 = vpop.f32.mrf.mxu0 }
 0x164   : > { %v840_v23 = vpop.f32.mrf.mxu1  ;;  %v844_v44 = vadd.f32 %v769_v26, %v669_v38 }
 0x165   : > { %v771_v28 = vpop.f32.mrf.mxu0  ;;  %v846_v45 = vadd.f32 %v840_v23, %v671_v39 }
 0x166   : > { %v1908_v25 = vpop.f32.mrf.mxu1  ;;  %v845_v47 = vadd.f32 %v771_v28, %v670_v43 }
 0x16b   : > { %v944_v30 = vpop.f32.mrf.mxu0 }
 0x16c   : > { %v1015_v27 = vpop.f32.mrf.mxu1  ;;  %v1019_v48 = vadd.f32 %v944_v30, %v844_v44 }
 0x16d   : > { %v946_v32 = vpop.f32.mrf.mxu0  ;;  %v1021_v49 = vadd.f32 %v1015_v27, %v846_v45 }
 0x16e   : > { %v1913_v29 = vpop.f32.mrf.mxu1  ;;  %v1020_v54 = vadd.f32 %v946_v32, %v845_v47 }
 0x173   : > { %v1190_v31 = vpop.f32.mrf.mxu1  ;;  %v1119_v36 = vpop.f32.mrf.mxu0 }
 0x174   : > { %v1194_v55 = vadd.f32 %v1119_v36, %v1019_v48  ;;  %v1196_v56 = vadd.f32 %v1190_v31, %v1021_v49 }
 0x175   : > { %v1918_v33 = vpop.f32.mrf.mxu1  ;;  %v1121_v41 = vpop.f32.mrf.mxu0 }
 0x176   : > { %v1195_v57 = vadd.f32 %v1121_v41, %v1020_v54 }
 0x17b   : > { %v1365_v40 = vpop.f32.mrf.mxu1  ;;  %v1294_v46 = vpop.f32.mrf.mxu0 }
 0x17c   : > { %v1369_v58 = vadd.f32 %v1294_v46, %v1194_v55  ;;  %v1371_v59 = vadd.f32 %v1365_v40, %v1196_v56 }
 0x17d   : > { %v1923_v42 = vpop.f32.mrf.mxu1  ;;  %v1296_v50 = vpop.f32.mrf.mxu0 }
 0x17e   : > { %v1370_v61 = vadd.f32 %v1296_v50, %v1195_v57 }
 0x183   : > { %v1540_v51 = vpop.f32.mrf.mxu1  ;;  %v1469_v52 = vpop.f32.mrf.mxu0 }
 0x184   : > { %v1544_v62 = vadd.f32 %v1469_v52, %v1369_v58  ;;  %v1546_v63 = vadd.f32 %v1540_v51, %v1371_v59 }
 0x185   : > { %v1928_v53 = vpop.f32.mrf.mxu1  ;;  %v1471_v60 = vpop.f32.mrf.mxu0 }
 0x186   : > { %v1545_v4 = vadd.f32 %v1471_v60, %v1370_v61 }
 0x18b   : > { %v1644_v2 = vpop.f32.mrf.mxu0  ;;  %v1715_v3 = vpop.f32.mrf.mxu1 }
 0x18c   : > { %v1719_v5 = vadd.f32 %v1644_v2, %v1544_v62  ;;  %v1721_v6 = vadd.f32 %v1715_v3, %v1546_v63 }
 0x18d   : > { %v1646_v7 = vpop.f32.mrf.mxu0  ;;  %v1933_v8 = vpop.f32.mrf.mxu1 }
 0x18e   : > { %v1720_v9 = vadd.f32 %v1646_v7, %v1545_v4  ;;  %v1728_v10 = vadd.f32 %v1726_v1, %v1719_v5  ;;  %v1730_v11 = vadd.f32 %v1726_v1, %v1721_v6 }
 0x190   : > { %v1729_v12 = vadd.f32 %v1726_v1, %v1720_v9  ;;  %1731 = vst [vmem:[%s163_s24] sm:$0xff] %v1728_v10  ;;  %1733 = vst [vmem:[%s163_s24 + $0x10] sm:$0xff] %v1730_v11 }
 0x192   : > { %1732 = vst [vmem:[%s163_s24 + $0x8] sm:$0xff] %v1729_v12 }
 0x193   : > { %2000 = shalt.err (!%p1997_p3)
}
 0x194   : > { %s2001_s6 = scalar_lea.hbm %s1747_s28, 384  ;;  %s2005_s9 = scalar_lea.hbm %s2313_s3, 768 }
 0x195   : > { %p2002_p4 = scmp.ne.s32.totalorder %s1747_s28, %s2001_s6  ;;  %p2006_p9 = scmp.lt.s32.totalorder %s1747_s28, %s2313_s3 }
 0x196   : > { %p2007_p10 = scmp.lt.s32.totalorder %s2005_s9, %s2001_s6 }
 0x197   : > { %p2003_p7 = pnand %p2002_p4, %p2119_p5 }
 0x198   : > { %p2008_p11 = por %p2007_p10, %p2006_p9 }
 0x199   : > { %p2004_p8 = pneg %p2003_p7 }
 0x19b   : > { %p2009_p12 = pnand %p2008_p11, %p2004_p8 }
 0x19d   : > { %2012 = shalt.err (!%p2009_p12)
}
 0x19e   : > { %1936 = dma.vmem_to_hbm [thread:$0]  (%p2119_p5), %s1750_s25, 384, %s1747_s28, %s1735_s29  }
 0x19f PF: > { %p1942_p13 = scmp.ge.s32.totalorder %s2047_s15, 2  ;;  %s1761_s17 = sand.u32 1, %s2035_s12  }
 0x1a0   : > { %s1762_s19 = scalar_lea.sflag [#allocation3], %s1761_s17 }
 0x1a1   : > { %p1939_p0 = pnand %p1942_p13, %p2123_p6 }
 0x1a3   : > { %p1940_p1 = pneg %p1939_p0 }
 0x1a5   : > { %2030 = dma.done.wait (%p1940_p1), %s1762_s19, 384  }
 0x1a6   : > { %2032 = vsyncadd (%p1940_p1), %s1762_s19, 4294966912  ;;  %p13_p2 = scmp.ge.s32.totalorder %s2106_s18, 4   ;;  %s2316_s12 = smov %s2039_s13 }
 0x1a7   : > { %s2317_s13 = smov %s2043_s14  ;;  %s2318_s14 = smov %s2117_s21 }
 0x1a8   : > { %s2319_s15 = smov %s2106_s18  ;;  %15 = sbr.rel (!%p13_p2) target bundleno = 3 (0x3), region = 75 }
 0x1ad   :  { %1767 = vsyncpa [#allocation3], 1 }
 0x1ae   :  { %1769 = vsyncpa [#allocation3 + $0x1], 1 }

</bundles_post_ra>
